<compile_context>
chip_gen: v7x
topology: tpu7x:2x2x1
jax: 0.10.0
libtpu: 0.0.40
codegen_flags: <defaults>
</compile_context>

<pallas_src>
import functools

import jax
import jax.numpy as jnp
from jax.experimental import pallas as pl
from jax.experimental.pallas import tpu as pltpu

_MIB = 1024 * 1024


def _crop_hw_kernel(x_ref, o_ref, *, pad_top, pad_left, out_h, out_w):
    # x_ref: (P_blk, in_h, in_w); o_ref: (P_blk, out_h, out_w). Static slice -> pure copy.
    o_ref[...] = x_ref[:, pad_top:pad_top + out_h, pad_left:pad_left + out_w]


def _crop_rows_flat_kernel(x_ref, o_ref, *, offset, out_len):
    # x_ref: (P_blk, in_h*in_w); o_ref: (P_blk, out_h*in_w). Contiguous slice along a lane-dense
    # last axis -> unmasked full-width stores regardless of the original W.
    o_ref[...] = x_ref[:, offset:offset + out_len]


def _tpu_vmem_and_cores():
    """(per-core VMEM bytes, TensorCores per chip) with conservative fallbacks."""
    vmem = 64 * _MIB   # conservative fallback: v7x per-TC VMEM
    cores = 1          # never force grid splits unless a multi-TC chip is positively detected
    try:
        info = pltpu.get_tpu_info()
        vmem = int(info.vmem_capacity_bytes)
        cores = 0
        for attr in ("num_tensorcores", "tensorcore_count", "num_cores", "core_count"):
            val = getattr(info, attr, None)
            if val:
                cores = int(val)
                break
        if cores <= 0:
            # Heuristic: v7x has 64 MiB VMEM per TC and 2 TCs; v5e/v6e have 128 MiB and 1 TC.
            cores = 2 if vmem <= 64 * _MIB else 1
    except Exception:
        pass
    return vmem, cores


def _largest_divisor_leq(n, limit):
    limit = max(1, min(int(n), int(limit)))
    for d in range(limit, 0, -1):
        if n % d == 0:
            return d
    return 1


def _choose_plane_block(planes, bytes_per_plane_step, vmem_budget, cores, align):
    """How many (N*C) planes to copy per grid step."""
    p_cap = max(1, min(planes, vmem_budget // max(1, bytes_per_plane_step)))
    if cores > 1 and planes > 1:
        # Multi-TensorCore chips (v7x) only: keep >= `cores` grid steps so the "parallel" axis
        # can shard across cores.  Single-TC chips (v5e/v6e) keep one maximal block.
        p_cap = min(p_cap, pl.cdiv(planes, cores))
    if p_cap >= planes:
        return planes
    # Strict sub-blocks on a second-minor axis must respect the (8, 128) tiling rule.
    p_cap = max(align, (p_cap // align) * align)
    if p_cap >= planes:
        return planes
    # Prefer an exact divisor near the cap (no ragged last block); otherwise let Pallas mask the
    # ragged final block instead of collapsing to tiny, per-step-overhead-bound blocks.
    div = _largest_divisor_leq(planes, p_cap)
    if div % align == 0 and 2 * div >= p_cap:
        return div
    return p_cap


def conv_transpose2d_same_pad(x, kernel_size, stride):
    """Crop x (NCHW) exactly as ConvTranspose2dSamePad.forward does."""
    if not isinstance(kernel_size, (list, tuple)):
        kernel_size = (kernel_size, kernel_size)
    if not isinstance(stride, (list, tuple)):
        stride = (stride, stride)

    n, c, in_h, in_w = x.shape
    pad_h = int(kernel_size[0]) - int(stride[0])
    pad_w = int(kernel_size[1]) - int(stride[1])
    if pad_h < 0 or pad_w < 0:
        raise ValueError(
            "ConvTranspose2dSamePad requires kernel_size >= stride per dimension "
            f"(got kernel_size={tuple(kernel_size)}, stride={tuple(stride)}).")

    # Same split convention as the PyTorch module: pad//2 at top/left, remainder at bottom/right.
    pad_top = pad_h // 2
    pad_bottom = pad_h - pad_top
    pad_left = pad_w // 2
    pad_right = pad_w - pad_left

    out_h = in_h - pad_top - pad_bottom
    out_w = in_w - pad_left - pad_right
    if out_h <= 0 or out_w <= 0:
        raise ValueError(f"Crop removes the whole spatial extent: out={out_h}x{out_w}")

    # Fast path: no crop at all -> identity, skip the kernel entirely.
    if pad_h == 0 and pad_w == 0:
        return x

    planes = n * c
    itemsize = jnp.dtype(x.dtype).itemsize
    vmem_cap, cores = _tpu_vmem_and_cores()
    vmem_budget = vmem_cap // 2          # per-step tile budget (in+out, double-buffered)
    vmem_limit = (vmem_cap * 3) // 4     # scoped-VMEM limit handed to the compiler (~96/48 MiB)
    compiler_params = pltpu.CompilerParams(
        dimension_semantics=("parallel",),
        vmem_limit_bytes=int(vmem_limit),
    )

    if pad_w == 0:
        # Row-only crop: flatten H,W so the crop is one contiguous slice along a huge, lane-dense
        # last axis (unmasked stores even when W < 128).  The flatten is wrapper-side layout
        # plumbing; the in-kernel slice is contiguous (offset 0 whenever pad_top == 0).
        in_flat = in_h * in_w
        out_flat = out_h * in_w
        x2 = x.reshape(planes, in_flat)
        in_bytes = in_flat * itemsize
        out_bytes = out_flat * itemsize
        align = max(8, 32 // itemsize)   # second-minor tiling alignment (8 f32 / 16 bf16 / 32 i8)
        p_blk = _choose_plane_block(planes, 2 * (in_bytes + out_bytes),
                                    vmem_budget, cores, align)
        grid = (pl.cdiv(planes, p_blk),)
        kernel = functools.partial(_crop_rows_flat_kernel,
                                   offset=pad_top * in_w, out_len=out_flat)
        out2 = pl.pallas_call(
            kernel,
            out_shape=jax.ShapeDtypeStruct((planes, out_flat), x.dtype),
            grid_spec=pltpu.PrefetchScalarGridSpec(
                num_scalar_prefetch=0,
                grid=grid,
                in_specs=[pl.BlockSpec((p_blk, in_flat), lambda i: (i, 0))],
                out_specs=pl.BlockSpec((p_blk, out_flat), lambda i: (i, 0)),
            ),
            compiler_params=compiler_params,
            cost_estimate=pl.CostEstimate(
                flops=0, transcendentals=0,
                bytes_accessed=planes * (in_bytes + out_bytes)),
        )(x2)
        return out2.reshape(n, c, out_h, out_w)

    # General case (pad_w > 0): full H/W blocks (satisfies the (8,128) rule for any spatial size),
    # crop with a static in-VMEM slice; output DMAs are contiguous full out-planes.
    x3 = x.reshape(planes, in_h, in_w)
    in_bytes = in_h * in_w * itemsize
    out_bytes = out_h * out_w * itemsize
    p_blk = _choose_plane_block(planes, 2 * (in_bytes + out_bytes),
                                vmem_budget, cores, align=1)
    grid = (pl.cdiv(planes, p_blk),)
    kernel = functools.partial(_crop_hw_kernel, pad_top=pad_top, pad_left=pad_left,
                               out_h=out_h, out_w=out_w)
    out3 = pl.pallas_call(
        kernel,
        out_shape=jax.ShapeDtypeStruct((planes, out_h, out_w), x.dtype),
        grid_spec=pltpu.PrefetchScalarGridSpec(
            num_scalar_prefetch=0,
            grid=grid,
            in_specs=[pl.BlockSpec((p_blk, in_h, in_w), lambda i: (i, 0, 0))],
            out_specs=pl.BlockSpec((p_blk, out_h, out_w), lambda i: (i, 0, 0)),
        ),
        compiler_params=compiler_params,
        cost_estimate=pl.CostEstimate(
            flops=0, transcendentals=0,
            bytes_accessed=planes * (in_bytes + out_bytes)),
    )(x3)
    return out3.reshape(n, c, out_h, out_w)


def _reference_crop(x, kernel_size, stride):
    if not isinstance(kernel_size, (list, tuple)):
        kernel_size = (kernel_size, kernel_size)
    if not isinstance(stride, (list, tuple)):
        stride = (stride, stride)
    in_h, in_w = x.shape[2], x.shape[3]
    pad_h = kernel_size[0] - stride[0]
    pad_w = kernel_size[1] - stride[1]
    pad_top, pad_left = pad_h // 2, pad_w // 2
    pad_bottom, pad_right = pad_h - pad_top, pad_w - pad_left
    return x[:, :, pad_top:in_h - pad_bottom, pad_left:in_w - pad_right]


if __name__ == "__main__":
    key = jax.random.PRNGKey(0)
    x = jax.random.normal(key, (2, 4, 16, 16), dtype=jnp.float32)

    # Case 1: kernel=3, stride=2 -> pad_h=pad_w=1 (crop last row/col); general 3D path.
    out = jax.block_until_ready(conv_transpose2d_same_pad(x, 3, 2))
    ref = _reference_crop(x, 3, 2)
    assert out.shape == ref.shape == (2, 4, 15, 15), (out.shape, ref.shape)
    assert jnp.array_equal(out, ref), "mismatch (kernel=3, stride=2)"

    # Case 2: kernel=(5,4), stride=(2,2) -> odd pad_h=3 (top=1,bottom=2), pad_w=2 (1 each side).
    out2 = jax.block_until_ready(conv_transpose2d_same_pad(x, (5, 4), (2, 2)))
    ref2 = _reference_crop(x, (5, 4), (2, 2))
    assert out2.shape == ref2.shape == (2, 4, 13, 14), (out2.shape, ref2.shape)
    assert jnp.array_equal(out2, ref2), "mismatch (kernel=(5,4), stride=(2,2))"

    # Case 3: kernel=(3,2), stride=(2,2) -> pad_w=0 -> flattened lane-dense path.
    out3 = jax.block_until_ready(conv_transpose2d_same_pad(x, (3, 2), (2, 2)))
    ref3 = _reference_crop(x, (3, 2), (2, 2))
    assert out3.shape == ref3.shape == (2, 4, 15, 16), (out3.shape, ref3.shape)
    assert jnp.array_equal(out3, ref3), "mismatch (kernel=(3,2), stride=(2,2))"

    # Case 4: kernel == stride -> identity fast path (no pallas_call launched).
    ident = conv_transpose2d_same_pad(x, 2, 2)
    assert ident.shape == x.shape and jnp.array_equal(ident, x)

    print("KERNEL_OK")
</pallas_src>

<mosaic_0001>
module attributes {stable_mosaic.version = 11 : i64} {
  func.func @_crop_hw_kernel(%arg0: i32, %arg1: memref<8x16x16xf32, #tpu.memory_space<vmem>>, %arg2: memref<8x15x15xf32, #tpu.memory_space<vmem>>) attributes {dimension_semantics = [#tpu.dimension_semantics<parallel>], iteration_bounds = array<i64: 1>, scalar_prefetch = 0 : i64, scratch_operands = 0 : i64, tpu.core_type = #tpu.core_type<tc>, window_params = [{transform_indices = @transform_0, window_bounds = array<i64: 8, 16, 16>}, {transform_indices = @transform_1, window_bounds = array<i64: 8, 15, 15>}]} {
    %c0 = arith.constant 0 : index
    %c0_0 = arith.constant 0 : index
    %c0_1 = arith.constant 0 : index
    %0 = vector.load %arg1[%c0, %c0_0, %c0_1] : memref<8x16x16xf32, #tpu.memory_space<vmem>>, vector<8x15x15xf32>
    %c0_2 = arith.constant 0 : index
    %c0_3 = arith.constant 0 : index
    %c0_4 = arith.constant 0 : index
    %1 = vector.load %arg2[%c0_2, %c0_3, %c0_4] : memref<8x15x15xf32, #tpu.memory_space<vmem>>, vector<8x15x15xf32>
    tpu.vector_store %arg2[%c0_2, %c0_3, %c0_4], %0 {strides = array<i32>} : memref<8x15x15xf32, #tpu.memory_space<vmem>>, vector<8x15x15xf32>,
    return
  }
  func.func @transform_0(%arg0: i32) -> (i32, i32, i32) {
    %c0_i32 = arith.constant 0 : i32
    %c0_i32_0 = arith.constant 0 : i32
    %c0_i32_1 = arith.constant 0 : i32
    return %arg0, %c0_i32, %c0_i32_0 : i32, i32, i32
  }
  func.func @transform_1(%arg0: i32) -> (i32, i32, i32) {
    %c0_i32 = arith.constant 0 : i32
    %c0_i32_0 = arith.constant 0 : i32
    %c0_i32_1 = arith.constant 0 : i32
    return %arg0, %c0_i32, %c0_i32_0 : i32, i32, i32
  }
}

</mosaic_0001>

<bundles_post_ra>
// kernel: tpu_custom_call.1
= control target key start
LH: loop header
LB: loop body
LE: loop exit
PB: predicated region body
PF: predicated region fallthrough
CT: control target
= control target key end

     0   :  { %6 = vsyncpa [#allocation3], 0  ;;  %s88_s6 = smov [#allocation2]   ;;  %s177_s0 = inlined_call_operand.hbm [shape: f32[8,16,16], index: 0, kind: input, shape index: {}]   ;;  %s178_s1 = inlined_call_operand.vmem [shape: f32[8,15,15], index: 1, kind: output, shape index: {}]  }
   0x1   :  { %s12_s7 = sshll.u32 %s88_s6, 4  ;;  %s64_s10 = scalar_lea.hbm %s177_s0, 2048  ;;  %s13_s7 = int_to_ptr.vmem [resolvable:$true] %s12_s7 }
   0x2   :  { %p65_p0 = scmp.ne.s32.totalorder %s177_s0, %s64_s10  ;;  %p68_p1 = scmp.lt.u32.totalorder %s64_s10, %s177_s0 }
   0x4   :  { %p70_p2 = pnand %p68_p1, %p65_p0 }
   0x6   :  { %73 = shalt.err (!%p70_p2)
}
   0x7   :  { %s74_s15 = scalar_lea.vmem %s13_s7, 2048  ;;  %p79_p4 = scmp.lt.s32.totalorder %s13_s7, %s13_s7 }
   0x8   :  { %p75_p3 = scmp.ne.s32.totalorder %s13_s7, %s74_s15  ;;  %p80_p5 = scmp.lt.s32.totalorder %s74_s15, %s74_s15 }
   0xa   :  { %p81_p6 = por %p80_p5, %p79_p4 }
   0xc   :  { %p82_p7 = pnand %p81_p6, %p75_p3 }
   0xe   :  { %85 = shalt.err (!%p82_p7)
}
   0xf   :  { %s89_s16 = smov 128   ;;  %s90_s17 = smov 8  }
  0x10   :  { %18 = dma.hbm_to_vmem [thread:$0]  %s177_s0, 2048, %s13_s7, [#allocation3], %s89_s16, %s89_s16, %s90_s17  }
  0x11   :  { %86 = dma.done.wait [#allocation3], 2048  }
  0x12   :  { %87 = vsyncadd [#allocation3], 4294965248  ;;  %vm38_vm0 = vcmask 121856   ;;  %vm40_vm1 = vcmask 120832   ;;  %v22_v0 = vld [vmem:[#allocation2] sm:$0xff]  ;;  %v24_v2 = vld [vmem:[#allocation2 + $0x10] sm:$0xff] }
  0x13   :  { %v23_v1 = vld [vmem:[#allocation2 + $0x8] sm:$0x7f]  ;;  %39 = vst.msk [vmem:[%s178_s1] sm:$0xff] %vm38_vm0, %v22_v0  ;;  %42 = vst.msk [vmem:[%s178_s1 + $0x10] sm:$0xff] %vm38_vm0, %v24_v2  ;;  %v25_v3 = vld [vmem:[#allocation2 + $0x18] sm:$0x7f] }
  0x14   :  { %41 = vst.msk [vmem:[%s178_s1 + $0x8] sm:$0x7f] %vm40_vm1, %v23_v1  ;;  %v26_v4 = vld [vmem:[#allocation2 + $0x20] sm:$0xff]  ;;  %v27_v5 = vld [vmem:[#allocation2 + $0x28] sm:$0x7f]  ;;  %v28_v6 = vld [vmem:[#allocation2 + $0x30] sm:$0xff] }
  0x15   :  { %43 = vst.msk [vmem:[%s178_s1 + $0x18] sm:$0x7f] %vm40_vm1, %v25_v3  ;;  %45 = vst.msk [vmem:[%s178_s1 + $0x28] sm:$0x7f] %vm40_vm1, %v27_v5  ;;  %v29_v7 = vld [vmem:[#allocation2 + $0x38] sm:$0x7f] }
  0x16   :  { %44 = vst.msk [vmem:[%s178_s1 + $0x20] sm:$0xff] %vm38_vm0, %v26_v4  ;;  %v30_v8 = vld [vmem:[#allocation2 + $0x40] sm:$0xff]  ;;  %46 = vst.msk [vmem:[%s178_s1 + $0x30] sm:$0xff] %vm38_vm0, %v28_v6  ;;  %v31_v9 = vld [vmem:[#allocation2 + $0x48] sm:$0x7f] }
  0x17   :  { %47 = vst.msk [vmem:[%s178_s1 + $0x38] sm:$0x7f] %vm40_vm1, %v29_v7  ;;  %v32_v10 = vld [vmem:[#allocation2 + $0x50] sm:$0xff]  ;;  %v33_v11 = vld [vmem:[#allocation2 + $0x58] sm:$0x7f]  ;;  %v34_v12 = vld [vmem:[#allocation2 + $0x60] sm:$0xff] }
  0x18   :  { %48 = vst.msk [vmem:[%s178_s1 + $0x40] sm:$0xff] %vm38_vm0, %v30_v8  ;;  %50 = vst.msk [vmem:[%s178_s1 + $0x50] sm:$0xff] %vm38_vm0, %v32_v10  ;;  %v35_v13 = vld [vmem:[#allocation2 + $0x68] sm:$0x7f]  ;;  %v36_v14 = vld [vmem:[#allocation2 + $0x70] sm:$0xff] }
  0x19   :  { %49 = vst.msk [vmem:[%s178_s1 + $0x48] sm:$0x7f] %vm40_vm1, %v31_v9  ;;  %51 = vst.msk [vmem:[%s178_s1 + $0x58] sm:$0x7f] %vm40_vm1, %v33_v11  ;;  %v37_v15 = vld [vmem:[#allocation2 + $0x78] sm:$0x7f] }
  0x1a   :  { %52 = vst.msk [vmem:[%s178_s1 + $0x60] sm:$0xff] %vm38_vm0, %v34_v12  ;;  %54 = vst.msk [vmem:[%s178_s1 + $0x70] sm:$0xff] %vm38_vm0, %v36_v14 }
  0x1b   :  { %53 = vst.msk [vmem:[%s178_s1 + $0x68] sm:$0x7f] %vm40_vm1, %v35_v13  ;;  %55 = vst.msk [vmem:[%s178_s1 + $0x78] sm:$0x7f] %vm40_vm1, %v37_v15 }
  0x1c   :  { %60 = vsyncpa [#allocation3], 1 }

</bundles_post_ra>
